<compile_context>
chip_gen: v7x
topology: tpu7x:2x2x1
jax: 0.10.0
libtpu: 0.0.40
codegen_flags: <defaults>
</compile_context>

<pallas_src>
from functools import partial

import jax
import jax.numpy as jnp
from jax import lax
from jax.experimental import pallas as pl
from jax.experimental.pallas import tpu as pltpu


# ----------------------------------------------------------------------------
# Kernel: one grid step = one independent sequence group; whole T-step
# recurrence unrolled in-kernel, everything VMEM-resident.
# ----------------------------------------------------------------------------
def rnn_fused_kernel(base_ref, x_ref, h0_ref,
                     w_i_ref, w_h_ref, w2_ref,
                     out_ref, h_final_ref,
                     *, seq_len, batch, hid_sz):
    # Fused column layout of the "wide" first layer (WIDE = hid + out + out):
    #   z = [ i2h(combined) | i2o(combined) | hid @ W2_h + b_o2o ]
    #
    # Non-recurrent input contribution for ALL timesteps in one MXU push
    # (M = T*B rows instead of B); x_ref is (T*B, in), w_i_ref is (in, WIDE)
    # with zero columns in the trailing `out` block.
    xz = jnp.dot(x_ref[...], w_i_ref[...],
                 preferred_element_type=jnp.float32)          # (T*B, WIDE)

    base = base_ref[...]          # (B, WIDE): category term + fused biases
    w_h = w_h_ref[...]            # (hid, WIDE) = [W_i2h_h | W_i2o_h | W_o2o_h]
    w2 = w2_ref[...]              # (WIDE, out) = [[0]; [W2_o]; [I_out]]

    hid = h0_ref[...]             # (B, hid) f32

    # Statically unrolled recurrence (T is small & static).  Only the
    # hid @ w_h push sits on the recurrent dependency chain; the logits push
    # and the log-softmax of step t overlap with step t+1.
    for t in range(seq_len):
        z = (base
             + xz[t * batch:(t + 1) * batch, :]               # aligned slice
             + jnp.dot(hid, w_h, preferred_element_type=jnp.float32))

        # logits = i2o_out @ W2_o + (hid @ W2_h + b_o2o), via the padded W2
        # (no lane-offset slicing of z needed).
        logits = jnp.dot(z, w2, preferred_element_type=jnp.float32)

        # Dropout(p=0.1) -> identity (eval-mode semantics).
        # TODO(synk): training-mode dropout (pltpu.prng_random_bits mask) not emitted.

        # LogSoftmax(dim=1), numerically stable, f32.
        m = jnp.max(logits, axis=1, keepdims=True)
        shifted = logits - m
        lse = jnp.log(jnp.sum(jnp.exp(shifted), axis=1, keepdims=True))
        out_ref[t] = shifted - lse

        # Hidden carry = lane-aligned prefix of z (i2h output).
        hid = z[:, :hid_sz]

    h_final_ref[...] = hid        # written once, after the loop


# ----------------------------------------------------------------------------
# One-time parameter preparation (hoisted out of the per-call path).
# ----------------------------------------------------------------------------
def prepare_params(raw_params, n_categories, input_size):
    """raw_params are torch-layout (out, in) Linear weights + biases."""
    w_i2o, b_i2o, w_i2h, b_i2h, w_o2o, b_o2o = raw_params
    out_sz = w_i2o.shape[0]
    hid_sz = w_i2h.shape[0]

    # Fuse i2h and i2o along the output axis, hidden-first column order, and
    # transpose once to (in_features, out_features).
    w1 = jnp.concatenate([w_i2h, w_i2o], axis=0).T      # (ncat+in+hid, hid+out)
    w1_c = w1[:n_categories]                            # (ncat, hid+out)
    w1_x = w1[n_categories:n_categories + input_size]   # (in,   hid+out)
    w1_h = w1[n_categories + input_size:]               # (hid,  hid+out)

    # o2o input is cat((output, hidden), dim=1): split along the input axis.
    w2_o = w_o2o[:, :out_sz].T                          # (out, out)
    w2_h = w_o2o[:, out_sz:].T                          # (hid, out)

    # Wide fusion: columns = [ i2h | i2o | o2o-hidden-term ].
    w_wide_c = jnp.concatenate(
        [w1_c, jnp.zeros((n_categories, out_sz), jnp.float32)], axis=1)
    w_wide_i = jnp.concatenate(
        [w1_x, jnp.zeros((input_size, out_sz), jnp.float32)], axis=1)
    w_wide_h = jnp.concatenate([w1_h, w2_h], axis=1)    # (hid, hid+2*out)
    b_wide = jnp.concatenate([b_i2h, b_i2o, b_o2o])     # (hid+2*out,)

    # Second matmul: z @ w2_pad = output @ W2_o + (hid @ W2_h + b_o2o).
    w2_pad = jnp.concatenate(
        [jnp.zeros((hid_sz, out_sz), jnp.float32),
         w2_o,
         jnp.eye(out_sz, dtype=jnp.float32)], axis=0)   # (hid+2*out, out)

    return (w_wide_c, b_wide, w_wide_i, w_wide_h, w2_pad)


# ----------------------------------------------------------------------------
# Fused forward over G independent sequence groups: one pallas_call.
# ----------------------------------------------------------------------------
def rnn_sequence_forward_grouped(category, inputs_seq, h0, prepped):
    """category: (G,B,ncat); inputs_seq: (G,T,B,in); h0: (G,B,hid)."""
    w_wide_c, b_wide, w_wide_i, w_wide_h, w2_pad = prepped
    G, T, B, in_sz = inputs_seq.shape
    hid_sz = h0.shape[-1]
    wide = w_wide_i.shape[1]
    out_sz = w2_pad.shape[1]

    # Category contribution + fused biases: constant across time -> once.
    base = jnp.dot(category, w_wide_c,
                   precision=lax.Precision.HIGHEST) + b_wide     # (G,B,WIDE)
    # Flatten time into the sublane dim so the kernel's big x-push needs no
    # in-kernel reshape (free XLA reshape on HBM).
    x2d = inputs_seq.reshape(G, T * B, in_sz)

    const2 = lambda g: (0, 0)
    out_seq, h_final = pl.pallas_call(
        partial(rnn_fused_kernel, seq_len=T, batch=B, hid_sz=hid_sz),
        grid=(G,),
        in_specs=[
            pl.BlockSpec((None, B, wide), lambda g: (g, 0, 0)),        # base
            pl.BlockSpec((None, T * B, in_sz), lambda g: (g, 0, 0)),   # x (resident)
            pl.BlockSpec((None, B, hid_sz), lambda g: (g, 0, 0)),      # h0
            pl.BlockSpec((in_sz, wide), const2),                       # W_wide_i
            pl.BlockSpec((hid_sz, wide), const2),                      # W_wide_h
            pl.BlockSpec((wide, out_sz), const2),                      # W2_pad
        ],
        out_specs=(
            pl.BlockSpec((None, T, B, out_sz), lambda g: (g, 0, 0, 0)),  # outputs
            pl.BlockSpec((None, B, hid_sz), lambda g: (g, 0, 0)),        # final h
        ),
        out_shape=(
            jax.ShapeDtypeStruct((G, T, B, out_sz), jnp.float32),
            jax.ShapeDtypeStruct((G, B, hid_sz), jnp.float32),
        ),
        compiler_params=pltpu.CompilerParams(
            # Independent groups -> shardable across v7x's two TensorCores.
            dimension_semantics=("parallel",)),
    )(base, x2d, h0, w_wide_i, w_wide_h, w2_pad)
    return out_seq, h_final


def rnn_sequence_forward(category, inputs_seq, h0, prepped):
    """Single sequence group: category (B,ncat), inputs_seq (T,B,in), h0 (B,hid)."""
    out_seq, h_final = rnn_sequence_forward_grouped(
        category[None], inputs_seq[None], h0[None], prepped)
    return out_seq[0], h_final[0]


def rnn_forward(category, x, hidden, prepped):
    """Single-step forward, exactly the torch module's forward()."""
    out_seq, h_next = rnn_sequence_forward(category, x[None], hidden, prepped)
    return out_seq[0], h_next


# ----------------------------------------------------------------------------
# Reference (pure JAX mirror of the torch module) + synthetic init.
# ----------------------------------------------------------------------------
def ref_forward(category, x, hidden, raw_params):
    w_i2o, b_i2o, w_i2h, b_i2h, w_o2o, b_o2o = raw_params
    hp = lax.Precision.HIGHEST
    combined = jnp.concatenate([category, x, hidden], axis=1)
    output = jnp.dot(combined, w_i2o.T, precision=hp) + b_i2o
    next_hidden = jnp.dot(combined, w_i2h.T, precision=hp) + b_i2h
    out_combined = jnp.concatenate([output, hidden], axis=1)
    logits = jnp.dot(out_combined, w_o2o.T, precision=hp) + b_o2o
    return jax.nn.log_softmax(logits, axis=1), next_hidden


def init_params(key, n_categories, input_size, hidden_size):
    """Deterministic synthetic init matching nn.Linear shapes (out, in)."""
    output_size = input_size
    combined = n_categories + input_size + hidden_size
    ks = jax.random.split(key, 6)

    def unif(k, shape, fan_in):
        bound = 1.0 / jnp.sqrt(fan_in)
        return jax.random.uniform(k, shape, jnp.float32, -bound, bound)

    w_i2o = unif(ks[0], (output_size, combined), combined)
    b_i2o = unif(ks[1], (output_size,), combined)
    w_i2h = unif(ks[2], (hidden_size, combined), combined)
    b_i2h = unif(ks[3], (hidden_size,), combined)
    w_o2o = unif(ks[4], (output_size, hidden_size + output_size),
                 hidden_size + output_size)
    b_o2o = unif(ks[5], (output_size,), hidden_size + output_size)
    return (w_i2o, b_i2o, w_i2h, b_i2h, w_o2o, b_o2o)


if __name__ == "__main__":
    key = jax.random.PRNGKey(0)
    G = 2                # independent sequence groups ('parallel' grid axis)
    B = 8                # batch per group (full sublane group)
    T = 8                # sequence length (fully unrolled in-kernel)
    n_categories = 4
    input_size = 16
    hidden_size = 32

    k_params, k_cat, k_in = jax.random.split(key, 3)
    raw_params = init_params(k_params, n_categories, input_size, hidden_size)
    prepped = prepare_params(raw_params, n_categories, input_size)   # once

    category = jax.random.normal(k_cat, (G, B, n_categories), jnp.float32)
    inputs_seq = jax.random.normal(k_in, (G, T, B, input_size), jnp.float32)
    h0 = jnp.zeros((G, B, hidden_size), jnp.float32)    # create_init_hidden()

    fwd = jax.jit(rnn_sequence_forward_grouped)
    out_seq, h_final = fwd(category, inputs_seq, h0, prepped)
    jax.block_until_ready((out_seq, h_final))

    # Shape + log-softmax normalization checks.
    assert out_seq.shape == (G, T, B, input_size)
    assert h_final.shape == (G, B, hidden_size)
    assert bool(jnp.allclose(jnp.sum(jnp.exp(out_seq), axis=-1), 1.0, atol=1e-4))

    # Step-by-step equivalence with the torch module's forward semantics.
    for g in range(G):
        hid = h0[g]
        for t in range(T):
            ref_out, hid = ref_forward(category[g], inputs_seq[g, t], hid,
                                       raw_params)
            assert bool(jnp.allclose(out_seq[g, t], ref_out,
                                     atol=5e-2, rtol=5e-2))
        assert bool(jnp.allclose(h_final[g], hid, atol=5e-2, rtol=5e-2))

    # Single-step API mirroring torch forward().
    out1, h1 = jax.jit(rnn_forward)(category[0], inputs_seq[0, 0], h0[0],
                                    prepped)
    ref_out1, ref_h1 = ref_forward(category[0], inputs_seq[0, 0], h0[0],
                                   raw_params)
    assert bool(jnp.allclose(out1, ref_out1, atol=5e-2, rtol=5e-2))
    assert bool(jnp.allclose(h1, ref_h1, atol=5e-2, rtol=5e-2))

    print("KERNEL_OK")
</pallas_src>

<mosaic_0001>
module attributes {stable_mosaic.version = 11 : i64} {
  func.func @rnn_fused_kernel(%arg0: i32, %arg1: memref<1x8x64xf32, #tpu.memory_space<vmem>>, %arg2: memref<1x64x16xf32, #tpu.memory_space<vmem>>, %arg3: memref<1x8x32xf32, #tpu.memory_space<vmem>>, %arg4: memref<16x64xf32, #tpu.memory_space<vmem>>, %arg5: memref<32x64xf32, #tpu.memory_space<vmem>>, %arg6: memref<64x16xf32, #tpu.memory_space<vmem>>, %arg7: memref<1x8x8x16xf32, #tpu.memory_space<vmem>>, %arg8: memref<1x8x32xf32, #tpu.memory_space<vmem>>) attributes {dimension_semantics = [#tpu.dimension_semantics<parallel>], iteration_bounds = array<i64: 2>, scalar_prefetch = 0 : i64, scratch_operands = 0 : i64, tpu.core_type = #tpu.core_type<tc>, window_params = [{transform_indices = @transform_0, window_bounds = array<i64: 1, 8, 64>}, {transform_indices = @transform_1, window_bounds = array<i64: 1, 64, 16>}, {transform_indices = @transform_2, window_bounds = array<i64: 1, 8, 32>}, {pipeline_mode = #tpu.pipeline_mode<synchronous>, transform_indices = @transform_3, window_bounds = array<i64: 16, 64>}, {pipeline_mode = #tpu.pipeline_mode<synchronous>, transform_indices = @transform_4, window_bounds = array<i64: 32, 64>}, {pipeline_mode = #tpu.pipeline_mode<synchronous>, transform_indices = @transform_5, window_bounds = array<i64: 64, 16>}, {transform_indices = @transform_6, window_bounds = array<i64: 1, 8, 8, 16>}, {transform_indices = @transform_7, window_bounds = array<i64: 1, 8, 32>}]} {
    %c0 = arith.constant 0 : index
    %c0_0 = arith.constant 0 : index
    %c0_1 = arith.constant 0 : index
    %0 = vector.load %arg2[%c0, %c0_0, %c0_1] : memref<1x64x16xf32, #tpu.memory_space<vmem>>, vector<1x64x16xf32>
    %1 = vector.shape_cast %0 : vector<1x64x16xf32> to vector<64x16xf32>
    %c0_2 = arith.constant 0 : index
    %c0_3 = arith.constant 0 : index
    %2 = vector.load %arg4[%c0_2, %c0_3] : memref<16x64xf32, #tpu.memory_space<vmem>>, vector<16x64xf32>
    %cst = arith.constant dense<0.000000e+00> : vector<64x64xf32>
    %3 = tpu.matmul %1, %2, %cst {dimension_numbers = #tpu.dot_dimension_numbers<[1], [0], [0], [1], [0, 0, 1, 1], [], []>} : vector<64x16xf32>, vector<16x64xf32>, vector<64x64xf32> -> vector<64x64xf32>
    %c0_4 = arith.constant 0 : index
    %c0_5 = arith.constant 0 : index
    %c0_6 = arith.constant 0 : index
    %4 = vector.load %arg1[%c0_4, %c0_5, %c0_6] : memref<1x8x64xf32, #tpu.memory_space<vmem>>, vector<1x8x64xf32>
    %5 = vector.shape_cast %4 : vector<1x8x64xf32> to vector<8x64xf32>
    %c0_7 = arith.constant 0 : index
    %c0_8 = arith.constant 0 : index
    %6 = vector.load %arg5[%c0_7, %c0_8] : memref<32x64xf32, #tpu.memory_space<vmem>>, vector<32x64xf32>
    %c0_9 = arith.constant 0 : index
    %c0_10 = arith.constant 0 : index
    %7 = vector.load %arg6[%c0_9, %c0_10] : memref<64x16xf32, #tpu.memory_space<vmem>>, vector<64x16xf32>
    %c0_11 = arith.constant 0 : index
    %c0_12 = arith.constant 0 : index
    %c0_13 = arith.constant 0 : index
    %8 = vector.load %arg3[%c0_11, %c0_12, %c0_13] : memref<1x8x32xf32, #tpu.memory_space<vmem>>, vector<1x8x32xf32>
    %9 = vector.shape_cast %8 : vector<1x8x32xf32> to vector<8x32xf32>
    %10 = vector.extract_strided_slice %3 {offsets = [0, 0], sizes = [8, 64], strides = [1, 1]} : vector<64x64xf32> to vector<8x64xf32>
    %11 = arith.addf %5, %10 : vector<8x64xf32>
    %cst_14 = arith.constant dense<0.000000e+00> : vector<8x64xf32>
    %12 = tpu.matmul %9, %6, %cst_14 {dimension_numbers = #tpu.dot_dimension_numbers<[1], [0], [0], [1], [0, 0, 1, 1], [], []>} : vector<8x32xf32>, vector<32x64xf32>, vector<8x64xf32> -> vector<8x64xf32>
    %13 = arith.addf %11, %12 : vector<8x64xf32>
    %cst_15 = arith.constant dense<0.000000e+00> : vector<8x16xf32>
    %14 = tpu.matmul %13, %7, %cst_15 {dimension_numbers = #tpu.dot_dimension_numbers<[1], [0], [0], [1], [0, 0, 1, 1], [], []>} : vector<8x64xf32>, vector<64x16xf32>, vector<8x16xf32> -> vector<8x16xf32>
    %cst_16 = arith.constant dense<0xFF800000> : vector<8xf32>
    %15 = vector.multi_reduction <maximumf>, %14, %cst_16 [1] : vector<8x16xf32> to vector<8xf32>
    %16 = vector.shape_cast %15 : vector<8xf32> to vector<8x1xf32>
    %17 = vector.broadcast %16 : vector<8x1xf32> to vector<8x16xf32>
    %18 = arith.subf %14, %17 : vector<8x16xf32>
    %19 = math.exp %18 : vector<8x16xf32>
    %cst_17 = arith.constant dense<0.000000e+00> : vector<8xf32>
    %20 = vector.multi_reduction <add>, %19, %cst_17 [1] : vector<8x16xf32> to vector<8xf32>
    %21 = vector.shape_cast %20 : vector<8xf32> to vector<8x1xf32>
    %22 = math.log %21 : vector<8x1xf32>
    %23 = vector.broadcast %22 : vector<8x1xf32> to vector<8x16xf32>
    %24 = arith.subf %18, %23 : vector<8x16xf32>
    %c0_18 = arith.constant 0 : index
    %c0_19 = arith.constant 0 : index
    %c0_20 = arith.constant 0 : index
    %c0_21 = arith.constant 0 : index
    %25 = vector.load %arg7[%c0_18, %c0_19, %c0_20, %c0_21] : memref<1x8x8x16xf32, #tpu.memory_space<vmem>>, vector<1x1x8x16xf32>
    %26 = vector.shape_cast %25 : vector<1x1x8x16xf32> to vector<8x16xf32>
    %27 = vector.shape_cast %24 : vector<8x16xf32> to vector<1x1x8x16xf32>
    tpu.vector_store %arg7[%c0_18, %c0_19, %c0_20, %c0_21], %27 {strides = array<i32>} : memref<1x8x8x16xf32, #tpu.memory_space<vmem>>, vector<1x1x8x16xf32>,
    %28 = vector.extract_strided_slice %13 {offsets = [0, 0], sizes = [8, 32], strides = [1, 1]} : vector<8x64xf32> to vector<8x32xf32>
    %29 = vector.extract_strided_slice %3 {offsets = [8, 0], sizes = [8, 64], strides = [1, 1]} : vector<64x64xf32> to vector<8x64xf32>
    %30 = arith.addf %5, %29 : vector<8x64xf32>
    %cst_22 = arith.constant dense<0.000000e+00> : vector<8x64xf32>
    %31 = tpu.matmul %28, %6, %cst_22 {dimension_numbers = #tpu.dot_dimension_numbers<[1], [0], [0], [1], [0, 0, 1, 1], [], []>} : vector<8x32xf32>, vector<32x64xf32>, vector<8x64xf32> -> vector<8x64xf32>
    %32 = arith.addf %30, %31 : vector<8x64xf32>
    %cst_23 = arith.constant dense<0.000000e+00> : vector<8x16xf32>
    %33 = tpu.matmul %32, %7, %cst_23 {dimension_numbers = #tpu.dot_dimension_numbers<[1], [0], [0], [1], [0, 0, 1, 1], [], []>} : vector<8x64xf32>, vector<64x16xf32>, vector<8x16xf32> -> vector<8x16xf32>
    %cst_24 = arith.constant dense<0xFF800000> : vector<8xf32>
    %34 = vector.multi_reduction <maximumf>, %33, %cst_24 [1] : vector<8x16xf32> to vector<8xf32>
    %35 = vector.shape_cast %34 : vector<8xf32> to vector<8x1xf32>
    %36 = vector.broadcast %35 : vector<8x1xf32> to vector<8x16xf32>
    %37 = arith.subf %33, %36 : vector<8x16xf32>
    %38 = math.exp %37 : vector<8x16xf32>
    %cst_25 = arith.constant dense<0.000000e+00> : vector<8xf32>
    %39 = vector.multi_reduction <add>, %38, %cst_25 [1] : vector<8x16xf32> to vector<8xf32>
    %40 = vector.shape_cast %39 : vector<8xf32> to vector<8x1xf32>
    %41 = math.log %40 : vector<8x1xf32>
    %42 = vector.broadcast %41 : vector<8x1xf32> to vector<8x16xf32>
    %43 = arith.subf %37, %42 : vector<8x16xf32>
    %c0_26 = arith.constant 0 : index
    %c1 = arith.constant 1 : index
    %c0_27 = arith.constant 0 : index
    %c0_28 = arith.constant 0 : index
    %44 = vector.load %arg7[%c0_26, %c1, %c0_27, %c0_28] : memref<1x8x8x16xf32, #tpu.memory_space<vmem>>, vector<1x1x8x16xf32>
    %45 = vector.shape_cast %44 : vector<1x1x8x16xf32> to vector<8x16xf32>
    %46 = vector.shape_cast %43 : vector<8x16xf32> to vector<1x1x8x16xf32>
    tpu.vector_store %arg7[%c0_26, %c1, %c0_27, %c0_28], %46 {strides = array<i32>} : memref<1x8x8x16xf32, #tpu.memory_space<vmem>>, vector<1x1x8x16xf32>,
    %47 = vector.extract_strided_slice %32 {offsets = [0, 0], sizes = [8, 32], strides = [1, 1]} : vector<8x64xf32> to vector<8x32xf32>
    %48 = vector.extract_strided_slice %3 {offsets = [16, 0], sizes = [8, 64], strides = [1, 1]} : vector<64x64xf32> to vector<8x64xf32>
    %49 = arith.addf %5, %48 : vector<8x64xf32>
    %cst_29 = arith.constant dense<0.000000e+00> : vector<8x64xf32>
    %50 = tpu.matmul %47, %6, %cst_29 {dimension_numbers = #tpu.dot_dimension_numbers<[1], [0], [0], [1], [0, 0, 1, 1], [], []>} : vector<8x32xf32>, vector<32x64xf32>, vector<8x64xf32> -> vector<8x64xf32>
    %51 = arith.addf %49, %50 : vector<8x64xf32>
    %cst_30 = arith.constant dense<0.000000e+00> : vector<8x16xf32>
    %52 = tpu.matmul %51, %7, %cst_30 {dimension_numbers = #tpu.dot_dimension_numbers<[1], [0], [0], [1], [0, 0, 1, 1], [], []>} : vector<8x64xf32>, vector<64x16xf32>, vector<8x16xf32> -> vector<8x16xf32>
    %cst_31 = arith.constant dense<0xFF800000> : vector<8xf32>
    %53 = vector.multi_reduction <maximumf>, %52, %cst_31 [1] : vector<8x16xf32> to vector<8xf32>
    %54 = vector.shape_cast %53 : vector<8xf32> to vector<8x1xf32>
    %55 = vector.broadcast %54 : vector<8x1xf32> to vector<8x16xf32>
    %56 = arith.subf %52, %55 : vector<8x16xf32>
    %57 = math.exp %56 : vector<8x16xf32>
    %cst_32 = arith.constant dense<0.000000e+00> : vector<8xf32>
    %58 = vector.multi_reduction <add>, %57, %cst_32 [1] : vector<8x16xf32> to vector<8xf32>
    %59 = vector.shape_cast %58 : vector<8xf32> to vector<8x1xf32>
    %60 = math.log %59 : vector<8x1xf32>
    %61 = vector.broadcast %60 : vector<8x1xf32> to vector<8x16xf32>
    %62 = arith.subf %56, %61 : vector<8x16xf32>
    %c0_33 = arith.constant 0 : index
    %c2 = arith.constant 2 : index
    %c0_34 = arith.constant 0 : index
    %c0_35 = arith.constant 0 : index
    %63 = vector.load %arg7[%c0_33, %c2, %c0_34, %c0_35] : memref<1x8x8x16xf32, #tpu.memory_space<vmem>>, vector<1x1x8x16xf32>
    %64 = vector.shape_cast %63 : vector<1x1x8x16xf32> to vector<8x16xf32>
    %65 = vector.shape_cast %62 : vector<8x16xf32> to vector<1x1x8x16xf32>
    tpu.vector_store %arg7[%c0_33, %c2, %c0_34, %c0_35], %65 {strides = array<i32>} : memref<1x8x8x16xf32, #tpu.memory_space<vmem>>, vector<1x1x8x16xf32>,
    %66 = vector.extract_strided_slice %51 {offsets = [0, 0], sizes = [8, 32], strides = [1, 1]} : vector<8x64xf32> to vector<8x32xf32>
    %67 = vector.extract_strided_slice %3 {offsets = [24, 0], sizes = [8, 64], strides = [1, 1]} : vector<64x64xf32> to vector<8x64xf32>
    %68 = arith.addf %5, %67 : vector<8x64xf32>
    %cst_36 = arith.constant dense<0.000000e+00> : vector<8x64xf32>
    %69 = tpu.matmul %66, %6, %cst_36 {dimension_numbers = #tpu.dot_dimension_numbers<[1], [0], [0], [1], [0, 0, 1, 1], [], []>} : vector<8x32xf32>, vector<32x64xf32>, vector<8x64xf32> -> vector<8x64xf32>
    %70 = arith.addf %68, %69 : vector<8x64xf32>
    %cst_37 = arith.constant dense<0.000000e+00> : vector<8x16xf32>
    %71 = tpu.matmul %70, %7, %cst_37 {dimension_numbers = #tpu.dot_dimension_numbers<[1], [0], [0], [1], [0, 0, 1, 1], [], []>} : vector<8x64xf32>, vector<64x16xf32>, vector<8x16xf32> -> vector<8x16xf32>
    %cst_38 = arith.constant dense<0xFF800000> : vector<8xf32>
    %72 = vector.multi_reduction <maximumf>, %71, %cst_38 [1] : vector<8x16xf32> to vector<8xf32>
    %73 = vector.shape_cast %72 : vector<8xf32> to vector<8x1xf32>
    %74 = vector.broadcast %73 : vector<8x1xf32> to vector<8x16xf32>
    %75 = arith.subf %71, %74 : vector<8x16xf32>
    %76 = math.exp %75 : vector<8x16xf32>
    %cst_39 = arith.constant dense<0.000000e+00> : vector<8xf32>
    %77 = vector.multi_reduction <add>, %76, %cst_39 [1] : vector<8x16xf32> to vector<8xf32>
    %78 = vector.shape_cast %77 : vector<8xf32> to vector<8x1xf32>
    %79 = math.log %78 : vector<8x1xf32>
    %80 = vector.broadcast %79 : vector<8x1xf32> to vector<8x16xf32>
    %81 = arith.subf %75, %80 : vector<8x16xf32>
    %c0_40 = arith.constant 0 : index
    %c3 = arith.constant 3 : index
    %c0_41 = arith.constant 0 : index
    %c0_42 = arith.constant 0 : index
    %82 = vector.load %arg7[%c0_40, %c3, %c0_41, %c0_42] : memref<1x8x8x16xf32, #tpu.memory_space<vmem>>, vector<1x1x8x16xf32>
    %83 = vector.shape_cast %82 : vector<1x1x8x16xf32> to vector<8x16xf32>
    %84 = vector.shape_cast %81 : vector<8x16xf32> to vector<1x1x8x16xf32>
    tpu.vector_store %arg7[%c0_40, %c3, %c0_41, %c0_42], %84 {strides = array<i32>} : memref<1x8x8x16xf32, #tpu.memory_space<vmem>>, vector<1x1x8x16xf32>,
    %85 = vector.extract_strided_slice %70 {offsets = [0, 0], sizes = [8, 32], strides = [1, 1]} : vector<8x64xf32> to vector<8x32xf32>
    %86 = vector.extract_strided_slice %3 {offsets = [32, 0], sizes = [8, 64], strides = [1, 1]} : vector<64x64xf32> to vector<8x64xf32>
    %87 = arith.addf %5, %86 : vector<8x64xf32>
    %cst_43 = arith.constant dense<0.000000e+00> : vector<8x64xf32>
    %88 = tpu.matmul %85, %6, %cst_43 {dimension_numbers = #tpu.dot_dimension_numbers<[1], [0], [0], [1], [0, 0, 1, 1], [], []>} : vector<8x32xf32>, vector<32x64xf32>, vector<8x64xf32> -> vector<8x64xf32>
    %89 = arith.addf %87, %88 : vector<8x64xf32>
    %cst_44 = arith.constant dense<0.000000e+00> : vector<8x16xf32>
    %90 = tpu.matmul %89, %7, %cst_44 {dimension_numbers = #tpu.dot_dimension_numbers<[1], [0], [0], [1], [0, 0, 1, 1], [], []>} : vector<8x64xf32>, vector<64x16xf32>, vector<8x16xf32> -> vector<8x16xf32>
    %cst_45 = arith.constant dense<0xFF800000> : vector<8xf32>
    %91 = vector.multi_reduction <maximumf>, %90, %cst_45 [1] : vector<8x16xf32> to vector<8xf32>
    %92 = vector.shape_cast %91 : vector<8xf32> to vector<8x1xf32>
    %93 = vector.broadcast %92 : vector<8x1xf32> to vector<8x16xf32>
    %94 = arith.subf %90, %93 : vector<8x16xf32>
    %95 = math.exp %94 : vector<8x16xf32>
    %cst_46 = arith.constant dense<0.000000e+00> : vector<8xf32>
    %96 = vector.multi_reduction <add>, %95, %cst_46 [1] : vector<8x16xf32> to vector<8xf32>
    %97 = vector.shape_cast %96 : vector<8xf32> to vector<8x1xf32>
    %98 = math.log %97 : vector<8x1xf32>
    %99 = vector.broadcast %98 : vector<8x1xf32> to vector<8x16xf32>
    %100 = arith.subf %94, %99 : vector<8x16xf32>
    %c0_47 = arith.constant 0 : index
    %c4 = arith.constant 4 : index
    %c0_48 = arith.constant 0 : index
    %c0_49 = arith.constant 0 : index
    %101 = vector.load %arg7[%c0_47, %c4, %c0_48, %c0_49] : memref<1x8x8x16xf32, #tpu.memory_space<vmem>>, vector<1x1x8x16xf32>
    %102 = vector.shape_cast %101 : vector<1x1x8x16xf32> to vector<8x16xf32>
    %103 = vector.shape_cast %100 : vector<8x16xf32> to vector<1x1x8x16xf32>
    tpu.vector_store %arg7[%c0_47, %c4, %c0_48, %c0_49], %103 {strides = array<i32>} : memref<1x8x8x16xf32, #tpu.memory_space<vmem>>, vector<1x1x8x16xf32>,
    %104 = vector.extract_strided_slice %89 {offsets = [0, 0], sizes = [8, 32], strides = [1, 1]} : vector<8x64xf32> to vector<8x32xf32>
    %105 = vector.extract_strided_slice %3 {offsets = [40, 0], sizes = [8, 64], strides = [1, 1]} : vector<64x64xf32> to vector<8x64xf32>
    %106 = arith.addf %5, %105 : vector<8x64xf32>
    %cst_50 = arith.constant dense<0.000000e+00> : vector<8x64xf32>
    %107 = tpu.matmul %104, %6, %cst_50 {dimension_numbers = #tpu.dot_dimension_numbers<[1], [0], [0], [1], [0, 0, 1, 1], [], []>} : vector<8x32xf32>, vector<32x64xf32>, vector<8x64xf32> -> vector<8x64xf32>
    %108 = arith.addf %106, %107 : vector<8x64xf32>
    %cst_51 = arith.constant dense<0.000000e+00> : vector<8x16xf32>
    %109 = tpu.matmul %108, %7, %cst_51 {dimension_numbers = #tpu.dot_dimension_numbers<[1], [0], [0], [1], [0, 0, 1, 1], [], []>} : vector<8x64xf32>, vector<64x16xf32>, vector<8x16xf32> -> vector<8x16xf32>
    %cst_52 = arith.constant dense<0xFF800000> : vector<8xf32>
    %110 = vector.multi_reduction <maximumf>, %109, %cst_52 [1] : vector<8x16xf32> to vector<8xf32>
    %111 = vector.shape_cast %110 : vector<8xf32> to vector<8x1xf32>
    %112 = vector.broadcast %111 : vector<8x1xf32> to vector<8x16xf32>
    %113 = arith.subf %109, %112 : vector<8x16xf32>
    %114 = math.exp %113 : vector<8x16xf32>
    %cst_53 = arith.constant dense<0.000000e+00> : vector<8xf32>
    %115 = vector.multi_reduction <add>, %114, %cst_53 [1] : vector<8x16xf32> to vector<8xf32>
    %116 = vector.shape_cast %115 : vector<8xf32> to vector<8x1xf32>
    %117 = math.log %116 : vector<8x1xf32>
    %118 = vector.broadcast %117 : vector<8x1xf32> to vector<8x16xf32>
    %119 = arith.subf %113, %118 : vector<8x16xf32>
    %c0_54 = arith.constant 0 : index
    %c5 = arith.constant 5 : index
    %c0_55 = arith.constant 0 : index
    %c0_56 = arith.constant 0 : index
    %120 = vector.load %arg7[%c0_54, %c5, %c0_55, %c0_56] : memref<1x8x8x16xf32, #tpu.memory_space<vmem>>, vector<1x1x8x16xf32>
    %121 = vector.shape_cast %120 : vector<1x1x8x16xf32> to vector<8x16xf32>
    %122 = vector.shape_cast %119 : vector<8x16xf32> to vector<1x1x8x16xf32>
    tpu.vector_store %arg7[%c0_54, %c5, %c0_55, %c0_56], %122 {strides = array<i32>} : memref<1x8x8x16xf32, #tpu.memory_space<vmem>>, vector<1x1x8x16xf32>,
    %123 = vector.extract_strided_slice %108 {offsets = [0, 0], sizes = [8, 32], strides = [1, 1]} : vector<8x64xf32> to vector<8x32xf32>
    %124 = vector.extract_strided_slice %3 {offsets = [48, 0], sizes = [8, 64], strides = [1, 1]} : vector<64x64xf32> to vector<8x64xf32>
    %125 = arith.addf %5, %124 : vector<8x64xf32>
    %cst_57 = arith.constant dense<0.000000e+00> : vector<8x64xf32>
    %126 = tpu.matmul %123, %6, %cst_57 {dimension_numbers = #tpu.dot_dimension_numbers<[1], [0], [0], [1], [0, 0, 1, 1], [], []>} : vector<8x32xf32>, vector<32x64xf32>, vector<8x64xf32> -> vector<8x64xf32>
    %127 = arith.addf %125, %126 : vector<8x64xf32>
    %cst_58 = arith.constant dense<0.000000e+00> : vector<8x16xf32>
    %128 = tpu.matmul %127, %7, %cst_58 {dimension_numbers = #tpu.dot_dimension_numbers<[1], [0], [0], [1], [0, 0, 1, 1], [], []>} : vector<8x64xf32>, vector<64x16xf32>, vector<8x16xf32> -> vector<8x16xf32>
    %cst_59 = arith.constant dense<0xFF800000> : vector<8xf32>
    %129 = vector.multi_reduction <maximumf>, %128, %cst_59 [1] : vector<8x16xf32> to vector<8xf32>
    %130 = vector.shape_cast %129 : vector<8xf32> to vector<8x1xf32>
    %131 = vector.broadcast %130 : vector<8x1xf32> to vector<8x16xf32>
    %132 = arith.subf %128, %131 : vector<8x16xf32>
    %133 = math.exp %132 : vector<8x16xf32>
    %cst_60 = arith.constant dense<0.000000e+00> : vector<8xf32>
    %134 = vector.multi_reduction <add>, %133, %cst_60 [1] : vector<8x16xf32> to vector<8xf32>
    %135 = vector.shape_cast %134 : vector<8xf32> to vector<8x1xf32>
    %136 = math.log %135 : vector<8x1xf32>
    %137 = vector.broadcast %136 : vector<8x1xf32> to vector<8x16xf32>
    %138 = arith.subf %132, %137 : vector<8x16xf32>
    %c0_61 = arith.constant 0 : index
    %c6 = arith.constant 6 : index
    %c0_62 = arith.constant 0 : index
    %c0_63 = arith.constant 0 : index
    %139 = vector.load %arg7[%c0_61, %c6, %c0_62, %c0_63] : memref<1x8x8x16xf32, #tpu.memory_space<vmem>>, vector<1x1x8x16xf32>
    %140 = vector.shape_cast %139 : vector<1x1x8x16xf32> to vector<8x16xf32>
    %141 = vector.shape_cast %138 : vector<8x16xf32> to vector<1x1x8x16xf32>
    tpu.vector_store %arg7[%c0_61, %c6, %c0_62, %c0_63], %141 {strides = array<i32>} : memref<1x8x8x16xf32, #tpu.memory_space<vmem>>, vector<1x1x8x16xf32>,
    %142 = vector.extract_strided_slice %127 {offsets = [0, 0], sizes = [8, 32], strides = [1, 1]} : vector<8x64xf32> to vector<8x32xf32>
    %143 = vector.extract_strided_slice %3 {offsets = [56, 0], sizes = [8, 64], strides = [1, 1]} : vector<64x64xf32> to vector<8x64xf32>
    %144 = arith.addf %5, %143 : vector<8x64xf32>
    %cst_64 = arith.constant dense<0.000000e+00> : vector<8x64xf32>
    %145 = tpu.matmul %142, %6, %cst_64 {dimension_numbers = #tpu.dot_dimension_numbers<[1], [0], [0], [1], [0, 0, 1, 1], [], []>} : vector<8x32xf32>, vector<32x64xf32>, vector<8x64xf32> -> vector<8x64xf32>
    %146 = arith.addf %144, %145 : vector<8x64xf32>
    %cst_65 = arith.constant dense<0.000000e+00> : vector<8x16xf32>
    %147 = tpu.matmul %146, %7, %cst_65 {dimension_numbers = #tpu.dot_dimension_numbers<[1], [0], [0], [1], [0, 0, 1, 1], [], []>} : vector<8x64xf32>, vector<64x16xf32>, vector<8x16xf32> -> vector<8x16xf32>
    %cst_66 = arith.constant dense<0xFF800000> : vector<8xf32>
    %148 = vector.multi_reduction <maximumf>, %147, %cst_66 [1] : vector<8x16xf32> to vector<8xf32>
    %149 = vector.shape_cast %148 : vector<8xf32> to vector<8x1xf32>
    %150 = vector.broadcast %149 : vector<8x1xf32> to vector<8x16xf32>
    %151 = arith.subf %147, %150 : vector<8x16xf32>
    %152 = math.exp %151 : vector<8x16xf32>
    %cst_67 = arith.constant dense<0.000000e+00> : vector<8xf32>
    %153 = vector.multi_reduction <add>, %152, %cst_67 [1] : vector<8x16xf32> to vector<8xf32>
    %154 = vector.shape_cast %153 : vector<8xf32> to vector<8x1xf32>
    %155 = math.log %154 : vector<8x1xf32>
    %156 = vector.broadcast %155 : vector<8x1xf32> to vector<8x16xf32>
    %157 = arith.subf %151, %156 : vector<8x16xf32>
    %c0_68 = arith.constant 0 : index
    %c7 = arith.constant 7 : index
    %c0_69 = arith.constant 0 : index
    %c0_70 = arith.constant 0 : index
    %158 = vector.load %arg7[%c0_68, %c7, %c0_69, %c0_70] : memref<1x8x8x16xf32, #tpu.memory_space<vmem>>, vector<1x1x8x16xf32>
    %159 = vector.shape_cast %158 : vector<1x1x8x16xf32> to vector<8x16xf32>
    %160 = vector.shape_cast %157 : vector<8x16xf32> to vector<1x1x8x16xf32>
    tpu.vector_store %arg7[%c0_68, %c7, %c0_69, %c0_70], %160 {strides = array<i32>} : memref<1x8x8x16xf32, #tpu.memory_space<vmem>>, vector<1x1x8x16xf32>,
    %161 = vector.extract_strided_slice %146 {offsets = [0, 0], sizes = [8, 32], strides = [1, 1]} : vector<8x64xf32> to vector<8x32xf32>
    %c0_71 = arith.constant 0 : index
    %c0_72 = arith.constant 0 : index
    %c0_73 = arith.constant 0 : index
    %162 = vector.load %arg8[%c0_71, %c0_72, %c0_73] : memref<1x8x32xf32, #tpu.memory_space<vmem>>, vector<1x8x32xf32>
    %163 = vector.shape_cast %162 : vector<1x8x32xf32> to vector<8x32xf32>
    %164 = vector.shape_cast %161 : vector<8x32xf32> to vector<1x8x32xf32>
    tpu.vector_store %arg8[%c0_71, %c0_72, %c0_73], %164 {strides = array<i32>} : memref<1x8x32xf32, #tpu.memory_space<vmem>>, vector<1x8x32xf32>,
    return
  }
  func.func @transform_0(%arg0: i32) -> (i32, i32, i32) {
    %c0_i32 = arith.constant 0 : i32
    %c0_i32_0 = arith.constant 0 : i32
    %c0_i32_1 = arith.constant 0 : i32
    return %arg0, %c0_i32, %c0_i32_0 : i32, i32, i32
  }
  func.func @transform_1(%arg0: i32) -> (i32, i32, i32) {
    %c0_i32 = arith.constant 0 : i32
    %c0_i32_0 = arith.constant 0 : i32
    %c0_i32_1 = arith.constant 0 : i32
    return %arg0, %c0_i32, %c0_i32_0 : i32, i32, i32
  }
  func.func @transform_2(%arg0: i32) -> (i32, i32, i32) {
    %c0_i32 = arith.constant 0 : i32
    %c0_i32_0 = arith.constant 0 : i32
    %c0_i32_1 = arith.constant 0 : i32
    return %arg0, %c0_i32, %c0_i32_0 : i32, i32, i32
  }
  func.func @transform_3(%arg0: i32) -> (i32, i32) {
    %c0_i32 = arith.constant 0 : i32
    %c0_i32_0 = arith.constant 0 : i32
    %c0_i32_1 = arith.constant 0 : i32
    return %c0_i32, %c0_i32_0 : i32, i32
  }
  func.func @transform_4(%arg0: i32) -> (i32, i32) {
    %c0_i32 = arith.constant 0 : i32
    %c0_i32_0 = arith.constant 0 : i32
    %c0_i32_1 = arith.constant 0 : i32
    return %c0_i32, %c0_i32_0 : i32, i32
  }
  func.func @transform_5(%arg0: i32) -> (i32, i32) {
    %c0_i32 = arith.constant 0 : i32
    %c0_i32_0 = arith.constant 0 : i32
    %c0_i32_1 = arith.constant 0 : i32
    return %c0_i32, %c0_i32_0 : i32, i32
  }
  func.func @transform_6(%arg0: i32) -> (i32, i32, i32, i32) {
    %c0_i32 = arith.constant 0 : i32
    %c0_i32_0 = arith.constant 0 : i32
    %c0_i32_1 = arith.constant 0 : i32
    %c0_i32_2 = arith.constant 0 : i32
    return %arg0, %c0_i32, %c0_i32_0, %c0_i32_1 : i32, i32, i32, i32
  }
  func.func @transform_7(%arg0: i32) -> (i32, i32, i32) {
    %c0_i32 = arith.constant 0 : i32
    %c0_i32_0 = arith.constant 0 : i32
    %c0_i32_1 = arith.constant 0 : i32
    return %arg0, %c0_i32, %c0_i32_0 : i32, i32, i32
  }
}

</mosaic_0001>

<bundles_post_ra>
// kernel: rnn_sequence_forward_grouped.1
= control target key start
LH: loop header
LB: loop body
LE: loop exit
PB: predicated region body
PF: predicated region fallthrough
CT: control target
= control target key end

     0   :  { %13 = vsyncpa [#allocation3], 0  ;;  %s3307_s0 = inlined_call_operand.vmem [shape: f32[2,8,64], index: 0, kind: input, shape index: {}]   ;;  %s3308_s1 = inlined_call_operand.hbm [shape: f32[2,64,16], index: 1, kind: input, shape index: {}]   ;;  %s3309_s2 = inlined_call_operand.vmem [shape: f32[2,8,32], index: 2, kind: input, shape index: {}]   ;;  %s3310_s3 = inlined_call_operand.vmem [shape: f32[16,64], index: 3, kind: input, shape index: {}]   ;;  %s3311_s4 = inlined_call_operand.vmem [shape: f32[32,64], index: 4, kind: input, shape index: {}]   ;;  %s3312_s5 = inlined_call_operand.vmem [shape: f32[64,16], index: 5, kind: input, shape index: {}]   ;;  %s3313_s6 = inlined_call_operand.hbm [shape: f32[2,8,8,16], index: 6, kind: output, shape index: {0}]   ;;  %s3314_s7 = inlined_call_operand.hbm [shape: f32[2,8,32], index: 7, kind: output, shape index: {1}]  }
   0x1   :  { %15 = vsyncpa [#allocation3 + $0x1], 0 }
   0x2   :  { %16 = vsyncpa [#allocation4], 0 }
   0x3   :  { %18 = vsyncpa [#allocation4 + $0x1], 0 }
   0x4   :  { %19 = vsyncpa [#allocation7], 0 }
   0x5   :  { %21 = vsyncpa [#allocation7 + $0x1], 0  ;;  %s2796_s24 = smov 0   ;;  %s2798_s25 = smov 0  }
   0x6   :  { %s2800_s26 = smov 0   ;;  %s2802_s27 = smov 0  }
   0x7 LB: > { %s2817_s28 = sadd.s32 4294967295, %s2744_s27   ;;  %s1948_s29 = sadd.s32 4294967294, %s2744_s27   ;;  %s2744_s27 = sphi %s2802_s27, %s3327_s27   ;;  %s2740_s26 = sphi %s2800_s26, %s3326_s26   ;;  %s2736_s25 = sphi %s2798_s25, %s3325_s25   ;;  %s2732_s24 = sphi %s2796_s24, %s3324_s24  }
   0x8   : > { %s2821_s30 = sadd.s32 1, %s2744_s27   ;;  %s60_s8 = sadd.s32 1, %s2740_s26 }
   0x9   : > { %s57_s9 = ssub.s32 %s2744_s27, %s2821_s30  ;;  %p67_p0 = scmp.ne.s32.totalorder %s2740_s26, %s2736_s25 }
   0xa   : > { %p58_p1 = scmp.eq.s32.totalorder %s57_s9, 0  ;;  %p68_p2 = scmp.eq.s32.totalorder %s2744_s27, 0 }
   0xb   : > { %p73_p3 = scmp.ne.s32.totalorder %s2736_s25, %s2732_s24  ;;  %p74_p4 = scmp.eq.s32.totalorder %s2817_s28, 0 }
   0xc   : > { %s2833_s10 = scalar_select %p58_p1, %s2740_s26, %s60_s8  }
   0xd   : > { %p2835_p5 = por %p68_p2, %p67_p0  ;;  %p2839_p6 = por %p74_p4, %p73_p3 }
   0xe   : > { %p186_p7 = scmp.eq.s32.totalorder %s2817_s28, 1  ;;  %p192_p8 = scmp.eq.s32.totalorder %s1948_s29, 1 }
   0xf   : > { %p2543_p10 = scmp.lt.s32.totalorder %s2744_s27, 2  ;;  %s254_s15 = sand.u32 1, %s2740_s26  }
  0x10   : > { %p2846_p11 = por %p186_p7, %p67_p0  ;;  %p2850_p12 = por %p192_p8, %p73_p3 }
  0x11   : > { %s1998_s16 = sshll.u32 %s2744_s27, 10  ;;  %s1951_s17 = sshll.u32 %s254_s15, 6 }
  0x12   : > { %s3318_s13 = scalar_select %p2846_p11, 1, 0 }
  0x13   : > { %s3319_s14 = scalar_select %p2850_p12, 1, 0 }
  0x14   : > { %s2859_s20 = scalar_lea.hbm %s3308_s1, %s1998_s16  ;;  %s258_s21 = scalar_lea.vmem [#allocation2], %s1951_s17 }
  0x15   : > { %s265_s22 = sshll.u32 %s258_s21, 4  ;;  %p2863_p13 = pnand %p2543_p10, %p2835_p5  ;;  %s2867_s22 = int_to_ptr.vmem [resolvable:$true] %s265_s22 }
  0x16   : > { %s2869_s29 = scalar_lea.sflag [#allocation3], %s254_s15  ;;  %s2616_s8 = scalar_lea.hbm %s2859_s20, 1024 }
  0x17   : > { %p2617_p0 = scmp.ne.s32.totalorder %s2859_s20, %s2616_s8  ;;  %p2618_p1 = pneg %p2863_p13 }
  0x18   : > { %s2621_s16 = scalar_lea.hbm %s3308_s1, 2048  ;;  %p2622_p4 = scmp.lt.u32.totalorder %s2859_s20, %s3308_s1 }
  0x19   : > { %p2619_p2 = pnand %p2618_p1, %p2617_p0  ;;  %p2623_p5 = scmp.lt.u32.totalorder %s2621_s16, %s2616_s8 }
  0x1a   : > { %p2625_p8 = scmp.lt.u32.totalorder %s2616_s8, %s2859_s20 }
  0x1b   : > { %p2620_p3 = pneg %p2619_p2  ;;  %p2624_p7 = por %p2623_p5, %p2622_p4 }
  0x1d   : > { %p2626_p10 = por %p2625_p8, %p2624_p7 }
  0x1f   : > { %p2627_p9 = pnand %p2626_p10, %p2620_p3 }
  0x21   : > { %2630 = shalt.err (!%p2627_p9)
}
  0x22   : > { %s2631_s15 = scalar_lea.vmem %s2867_s22, 1024  ;;  %s2746_s19 = smov [#allocation2]  }
  0x23   : > { %p2632_p0 = scmp.ne.s32.totalorder %s2867_s22, %s2631_s15  ;;  %s2636_s21 = sshll.u32 %s2746_s19, 4  ;;  %s2637_s21 = int_to_ptr.vmem [resolvable:$false] %s2636_s21 }
  0x24   : > { %s2638_s9 = scalar_lea.vmem %s2637_s21, 2048  ;;  %p2639_p11 = scmp.lt.s32.totalorder %s2867_s22, %s2637_s21 }
  0x25   : > { %p2634_p2 = pnand %p2632_p0, %p2618_p1  ;;  %p2640_p4 = scmp.lt.s32.totalorder %s2638_s9, %s2631_s15 }
  0x27   : > { %p2635_p12 = pneg %p2634_p2  ;;  %p2641_p5 = por %p2640_p4, %p2639_p11 }
  0x29   : > { %p2642_p7 = pnand %p2641_p5, %p2635_p12 }
  0x2b   : > { %2645 = shalt.err (!%p2642_p7)
}
  0x2c   : > { %s2747_s8 = smov 128   ;;  %s2748_s11 = smov 8  }
  0x2d   : > { %2535 = dma.hbm_to_vmem [thread:$0]  (!%p2863_p13), %s2859_s20, 1024, %s2867_s22, %s2869_s29, %s2747_s8, %s2747_s8, %s2748_s11  }
  0x2e   : > { %p1954_p9 = scmp.ge.s32.totalorder %s2744_s27, 1  ;;  %p280_p1 = scmp.lt.s32.totalorder %s2744_s27, 3 }
  0x30   : > { %p281_p3 = pnand %p1954_p9, %p280_p1 }
  0x31   : > { %s2900_s16 = sand.u32 (!%p281_p3), 1, %s2736_s25  }
  0x32   : > { %284 = sbr.rel (%p281_p3) target bundleno = 2333 (0x91d), region = 44  ;;  %s1955_s17 = sshll.u32 (!%p281_p3), %s2900_s16, 6 }
  0x33   : > { %s287_s18 = scalar_lea.sflag (!%p281_p3), [#allocation3], %s2900_s16  ;;  %s2906_s15 = scalar_lea.vmem (!%p281_p3), [#allocation2], %s1955_s17 }
  0x39   : > { %2719 = dma.done.wait (%p2839_p6), %s287_s18, 1024  }
  0x3a   : > { %2721 = vsyncadd (%p2839_p6), %s287_s18, 4294966272  ;;  %v2749_v0 = vmov 0.0|0.0   ;;  %vm2750_vm0 = vmmov 0   ;;  %v2751_v1 = vmov 0.0   ;;  %p334_p11 = scmp.lt.s32.totalorder %s2817_s28, 1  ;;  %vm352_vm1 = vcmask 130048  }
  0x3b   : > { %2382 = vmatprep.subr.bf16.mxu1 %v2749_v0  ;;  %2146 = vmatprep.mubr.msk.f32.mxu1 %vm2750_vm0, %v2751_v1  ;;  %v350_v2 = vld [vmem:[%s3310_s3] sm:$0xff]  ;;  %v351_v3 = vld [vmem:[%s3310_s3 + $0x8] sm:$0xff]  ;;  %v485_v9 = vld [vmem:[%s3311_s4 + $0x10] sm:$0xff]  ;;  %vm497_vm2 = vcmask 261120   ;;  %vm572_vm3 = vcmask 523264   ;;  %s3201_s9 = scalar_lea.vmem [#allocation5], %s1955_s17 }
  0x3c   : > { %s2917_s20 = scalar_select %p334_p11, %s2817_s28, 1  ;;  %v483_v4 = vld [vmem:[%s3311_s4] sm:$0xff]  ;;  %v2378_v5 = vpack.c.bf16 %v351_v3, %v350_v2  ;;  %v484_v6 = vld [vmem:[%s3311_s4 + $0x8] sm:$0xff]  ;;  %v486_v10 = vld [vmem:[%s3311_s4 + $0x18] sm:$0xff] }
  0x3d   : > { %v342_v7 = vld [vmem:[%s2906_s15] sm:$0xff]  ;;  %v2932_v8 = vpack.c.bf16 %v484_v6, %v483_v4  ;;  %v488_v12 = vld [vmem:[%s3312_s5 + $0x8] sm:$0xff]  ;;  %v2950_v14 = vpack.c.bf16 %v486_v10, %v485_v9  ;;  %v489_v16 = vld [vmem:[%s3312_s5 + $0x10] sm:$0xff]  ;;  %s1995_s17 = sshll.u32 %s2817_s28, 7  ;;  %s1793_s23 = scalar_lea.sflag [#allocation7], %s2900_s16 }
  0x3e   : > { %2126 = vmatprep.mubr.msk.f32.mxu0 %vm352_vm1, %v342_v7  ;;  %s1958_s12 = sshll.u32 %s2917_s20, 3  ;;  %2379 = vmatprep.subr.bf16.mxu0 %v2378_v5  ;;  %v487_v11 = vld [vmem:[%s3312_s5] sm:$0xff]  ;;  %v343_v13 = vld [vmem:[%s2906_s15 + $0x8] sm:$0xff]  ;;  %v490_v17 = vld [vmem:[%s3312_s5 + $0x18] sm:$0xff]  ;;  %s1957_s20 = sshll.u32 %s2900_s16, 3 }
  0x3f   : > { %2384 = vmatpush3.bf16.msra.mxu1 %v2932_v8  ;;  %2381 = vmatpush3.bf16.msra.mxu0 %v2378_v5  ;;  %v2952_v15 = vpack.c.bf16 %v488_v12, %v487_v11  ;;  %s341_s18 = scalar_lea.vmem %s3309_s2, %s1958_s12  ;;  %v344_v18 = vld [vmem:[%s2906_s15 + $0x10] sm:$0xff]  ;;  %v345_v20 = vld [vmem:[%s2906_s15 + $0x18] sm:$0xff]  ;;  %v2972_v21 = vpack.c.bf16 %v490_v17, %v489_v16  ;;  %v346_v22 = vld [vmem:[%s2906_s15 + $0x20] sm:$0xff]  ;;  %s3233_s22 = scalar_lea.hbm %s3314_s7, %s1995_s17 }
  0x40   : > { %2385 = vmatprep.subr.bf16.mxu1 %v2749_v0  ;;  %2388 = vmatprep.subr.bf16.mxu0 %v2749_v0  ;;  %v495_v19 = vld [vmem:[%s341_s18] sm:$0xff]  ;;  %v492_v24 = vld [vmem:[%s3312_s5 + $0x28] sm:$0xff]  ;;  %v348_v27 = vld [vmem:[%s2906_s15 + $0x30] sm:$0xff]  ;;  %p3321_p12 = scmp.ne.s32.totalorder %s3318_s13, 0  ;;  %s2752_s19 = smov [#allocation6]  }
  0x41   : > { %v491_v23 = vld [vmem:[%s3312_s5 + $0x20] sm:$0xff]  ;;  %v347_v25 = vld [vmem:[%s2906_s15 + $0x28] sm:$0xff]  ;;  %v493_v28 = vld [vmem:[%s3312_s5 + $0x30] sm:$0xff]  ;;  %s2650_s21 = sshll.u32 %s2752_s19, 4  ;;  %s2651_s21 = int_to_ptr.vmem [resolvable:$false] %s2650_s21 }
  0x42   : > { %2127 = vmatmul.mubr.msk.f32.vlgmr.msra.gmra.mrb[0].mxu0 %vm352_vm1, %v343_v13  ;;  %v2989_v26 = vpack.c.bf16 %v492_v24, %v491_v23  ;;  %v494_v29 = vld [vmem:[%s3312_s5 + $0x38] sm:$0xff] }
  0x43   : > { %2387 = vmatpush3.bf16.msra.mxu1 %v2950_v14  ;;  %2390 = vmatpush3.bf16.msra.mxu0 %v2952_v15  ;;  %v349_v30 = vld [vmem:[%s2906_s15 + $0x38] sm:$0xff]  ;;  %v3012_v31 = vpack.c.bf16 %v494_v29, %v493_v28  ;;  %s337_s15 = scalar_lea.vmem %s3307_s0, %s1958_s12  ;;  %s3191_s12 = scalar_lea.vmem [#allocation6], %s1957_s20 }
  0x44   : > { %2129 = vmatprep.mubr.msk.f32.mxu0 %vm352_vm1, %v344_v18  ;;  %2391 = vmatprep.subr.bf16.mxu0 %v2749_v0  ;;  %v3026_v32 = vld [vmem:[%s337_s15] sm:$0xff]  ;;  %s1822_s8 = sshll.u32 %s3191_s12, 4  ;;  %s2652_s15 = scalar_lea.vmem %s2651_s21, 256  ;;  %s1823_s8 = int_to_ptr.vmem [resolvable:$true] %s1822_s8 }
  0x45   : > { %2406 = vmatprep.subr.bf16.mxu1 %v2749_v0  ;;  %s2646_s29 = scalar_lea.vmem %s1823_s8, 128  ;;  %p2653_p10 = scmp.lt.s32.totalorder %s1823_s8, %s2651_s21 }
  0x46   : > { %2147 = vmatmul.mubr.msk.f32.vlgmr.msra.gmra.mrb[0].mxu1 %vm497_vm2, %v495_v19  ;;  %2130 = vmatmul.mubr.msk.f32.gmra.mrb[2].mxu0 %vm352_vm1, %v345_v20  ;;  %p2647_p6 = scmp.ne.s32.totalorder %s1823_s8, %s2646_s29  ;;  %p2654_p0 = scmp.lt.s32.totalorder %s2652_s15, %s2646_s29 }
  0x47   : > { %2393 = vmatpush3.bf16.msra.mxu0 %v2972_v21  ;;  %2132 = vmatprep.mubr.msk.f32.mxu0 %vm352_vm1, %v346_v22 }
  0x48   : > { %2394 = vmatprep.subr.bf16.mxu0 %v2749_v0  ;;  %2408 = vmatpush3.bf16.msra.mxu1 %v2952_v15  ;;  %p2648_p13 = pnand %p2647_p6, %p3321_p12  ;;  %p2655_p2 = por %p2654_p0, %p2653_p10 }
  0x49   : > { %2409 = vmatprep.subr.bf16.mxu1 %v2749_v0  ;;  %2195 = vmatprep.mubr.msk.f32.mxu1 %vm2750_vm0, %v2751_v1 }
  0x4a   : > { %2133 = vmatmul.mubr.msk.f32.gmra.mrb[4].mxu0 %vm352_vm1, %v347_v25  ;;  %p2649_p8 = pneg %p2648_p13 }
  0x4b   : > { %2396 = vmatpush3.bf16.msra.mxu0 %v2989_v26  ;;  %2135 = vmatprep.mubr.msk.f32.mxu0 %vm352_vm1, %v348_v27 }
  0x4c   : > { %2397 = vmatprep.subr.bf16.mxu0 %v2749_v0  ;;  %2411 = vmatpush3.bf16.msra.mxu1 %v2972_v21  ;;  %p2656_p4 = pnand %p2655_p2, %p2649_p8 }
  0x4d   : > { %2412 = vmatprep.subr.bf16.mxu1 %v2749_v0 }
  0x4e   : > { %2136 = vmatmul.mubr.msk.f32.gmra.mrb[6].mxu0 %vm352_vm1, %v349_v30 }
  0x4f   : > { %2399 = vmatpush3.bf16.msra.mxu0 %v3012_v31  ;;  %2165 = vmatprep.mubr.msk.f32.mxu0 %vm2750_vm0, %v2751_v1 }
  0x50   : > { %2414 = vmatpush3.bf16.msra.mxu1 %v2989_v26  ;;  %2400 = vmatprep.subr.bf16.mxu0 %v2749_v0 }
  0x51   : > { %2415 = vmatprep.subr.bf16.mxu1 %v2749_v0 }
  0x54   : > { %2417 = vmatpush3.bf16.msra.mxu1 %v3012_v31 }
  0x55   : > { %2436 = vmatprep.subr.bf16.mxu1 %v2749_v0 }
 0x115   : > { %v2128_v33 = vpop.f32.mrb[0].mxu0 }
 0x116   : > { %v443_v34 = vpop.f32.mrb[1].mxu0  ;;  %v659_v48 = vadd.f32 %v2128_v33, %v3026_v32 }
 0x117   : > { %v496_v35 = vadd.f32 %v3026_v32, %v443_v34 }
 0x119   : > { %v567_v36 = vpop.f32.mrb[0].mxu1  ;;  %v3029_v37 = vpop.f32.mrb[2].mxu0 }
 0x11a   : > { %v571_v38 = vadd.f32 %v567_v36, %v496_v35  ;;  %v2148_v39 = vpop.f32.mrb[1].mxu1  ;;  %v453_v40 = vpop.f32.mrb[3].mxu0  ;;  %v981_v59 = vadd.f32 %v3029_v37, %v3026_v32 }
 0x11b   : > { %v820_v52 = vadd.f32 %v3026_v32, %v453_v40 }
 0x11c   : > { %2166 = vmatmul.mubr.msk.f32.vlgmr.msra.gmra.mrb[8].mxu0 %vm572_vm3, %v571_v38 }
 0x11d   : > { %2402 = vmatpush3.bf16.msra.mxu0 %v2932_v8  ;;  %2176 = vmatprep.mubr.msk.f32.mxu0 %vm2750_vm0, %v2751_v1  ;;  %v3035_v41 = vpop.f32.mrb[4].mxu0 }
 0x11e   : > { %2403 = vmatprep.subr.bf16.mxu0 %v2749_v0  ;;  %v3038_v42 = vpop.f32.mrb[5].mxu0  ;;  %v1303_v12 = vadd.f32 %v3035_v41, %v3026_v32 }
 0x11f   : > { %v1142_v4 = vadd.f32 %v3026_v32, %v3038_v42 }
 0x121   : > { %2405 = vmatpush3.bf16.msra.mxu0 %v2950_v14  ;;  %v3049_v43 = vpop.f32.mrb[6].mxu0 }
 0x122   : > { %2418 = vmatprep.subr.bf16.mxu0 %v2749_v0  ;;  %v3051_v44 = vpop.f32.mrb[7].mxu0 }
 0x124   : > { %2177 = vmatmul.mubr.msk.f32.vlgmr.msra.gmra.mrb[10].mxu0 %vm497_vm2, %v571_v38 }
 0x125   : > { %2420 = vmatpush3.bf16.msra.mxu0 %v2932_v8  ;;  %2206 = vmatprep.mubr.msk.f32.mxu0 %vm2750_vm0, %v2751_v1 }
 0x126   : > { %2421 = vmatprep.subr.bf16.mxu0 %v2749_v0 }
 0x129   : > { %2423 = vmatpush3.bf16.msra.mxu0 %v2950_v14 }
 0x12a   : > { %2424 = vmatprep.subr.bf16.mxu0 %v2749_v0 }
 0x1ef   : > { %v3053_v45 = vpop.f32.mrb[8].mxu0 }
 0x1f0   : > { %v2167_v46 = vpop.f32.mrb[9].mxu0  ;;  %v646_v47 = vsel %vm352_vm1, %v3053_v45, -inf }
 0x1f1   : > { %647 = vmax.xlane.f32.xlu0 %v646_v47 }
 0x1f7   : > { %v728_v49 = vpop.f32.mrb[10].mxu0 }
 0x1f8   : > { %v732_v50 = vadd.f32 %v728_v49, %v659_v48  ;;  %v2178_v51 = vpop.f32.mrb[11].mxu0 }
 0x1fa   : > { %2196 = vmatmul.mubr.msk.f32.vlgmr.msra.gmra.mrb[2].mxu1 %vm572_vm3, %v732_v50  ;;  %2207 = vmatmul.mubr.msk.f32.vlgmr.msra.gmra.mrb[12].mxu0 %vm497_vm2, %v732_v50 }
 0x1fb   : > { %2426 = vmatpush3.bf16.msra.mxu0 %v2952_v15  ;;  %2438 = vmatpush3.bf16.msra.mxu1 %v2932_v8 }
 0x1fc   : > { %2427 = vmatprep.subr.bf16.mxu0 %v2749_v0  ;;  %2439 = vmatprep.subr.bf16.mxu1 %v2749_v0 }
 0x1fd   : > { %2225 = vmatprep.mubr.msk.f32.mxu0 %vm2750_vm0, %v2751_v1  ;;  %2236 = vmatprep.mubr.msk.f32.mxu1 %vm2750_vm0, %v2751_v1 }
 0x1ff   : > { %2429 = vmatpush3.bf16.msra.mxu0 %v2972_v21  ;;  %2441 = vmatpush3.bf16.msra.mxu1 %v2950_v14 }
 0x200   : > { %2430 = vmatprep.subr.bf16.mxu0 %v2749_v0  ;;  %2442 = vmatprep.subr.bf16.mxu1 %v2749_v0 }
 0x203   : > { %2432 = vmatpush3.bf16.msra.mxu0 %v2989_v26 }
 0x204   : > { %2433 = vmatprep.subr.bf16.mxu0 %v2749_v0 }
 0x207   : > { %2435 = vmatpush3.bf16.msra.mxu0 %v3012_v31 }
 0x208   : > { %2454 = vmatprep.subr.bf16.mxu0 %v2749_v0 }
 0x27e   : > { %v648_v28 = vpop.xlane.xlu0 %647 }
 0x27f   : > { %v649_v29 = vsub.f32 %v3053_v45, %v648_v28 }
 0x281   : > { %v650_v33 = vmul.f32 1.442695, %v649_v29 }
 0x283   : > { %2584 = vpow2.f32 %v650_v33 }
 0x28d   : > { %v2585_v41 = vpop.eup %2584 }
 0x28e   : > { %v652_v42 = vsel %vm352_vm1, %v2585_v41, 0.0 }
 0x2cd   : > { %v3077_v53 = vpop.f32.mrb[2].mxu1  ;;  %v889_v54 = vpop.f32.mrb[12].mxu0 }
 0x2ce   : > { %v893_v55 = vadd.f32 %v889_v54, %v820_v52  ;;  %v2197_v56 = vpop.f32.mrb[3].mxu1  ;;  %v2208_v57 = vpop.f32.mrb[13].mxu0  ;;  %v806_v58 = vsel %vm352_vm1, %v3077_v53, -inf }
 0x2cf   : > { %807 = vmax.xlane.f32.xlu0 %v806_v58 }
 0x2d0   : > { %2226 = vmatmul.mubr.msk.f32.vlgmr.msra.gmra.mrb[14].mxu0 %vm572_vm3, %v893_v55  ;;  %2237 = vmatmul.mubr.msk.f32.vlgmr.msra.gmra.mrb[4].mxu1 %vm497_vm2, %v893_v55 }
 0x2d1   : > { %2444 = vmatpush3.bf16.msra.mxu1 %v2952_v15  ;;  %2456 = vmatpush3.bf16.msra.mxu0 %v2932_v8 }
 0x2d2   : > { %2445 = vmatprep.subr.bf16.mxu1 %v2749_v0  ;;  %2457 = vmatprep.subr.bf16.mxu0 %v2749_v0 }
 0x2d3   : > { %2255 = vmatprep.mubr.msk.f32.mxu1 %vm2750_vm0, %v2751_v1  ;;  %2266 = vmatprep.mubr.msk.f32.mxu0 %vm2750_vm0, %v2751_v1 }
 0x2d5   : > { %2447 = vmatpush3.bf16.msra.mxu1 %v2972_v21  ;;  %2459 = vmatpush3.bf16.msra.mxu0 %v2950_v14 }
 0x2d6   : > { %2448 = vmatprep.subr.bf16.mxu1 %v2749_v0  ;;  %2460 = vmatprep.subr.bf16.mxu0 %v2749_v0 }
 0x2d9   : > { %2450 = vmatpush3.bf16.msra.mxu1 %v2989_v26 }
 0x2da   : > { %2451 = vmatprep.subr.bf16.mxu1 %v2749_v0 }
 0x2dd   : > { %2453 = vmatpush3.bf16.msra.mxu1 %v3012_v31 }
 0x2de   : > { %2472 = vmatprep.subr.bf16.mxu1 %v2749_v0 }
 0x3a3   : > { %v3101_v60 = vpop.f32.mrb[14].mxu0  ;;  %v1050_v61 = vpop.f32.mrb[4].mxu1 }
 0x3a4   : > { %v1054_v62 = vadd.f32 %v1050_v61, %v981_v59  ;;  %v2227_v63 = vpop.f32.mrb[15].mxu0  ;;  %v2238_v2 = vpop.f32.mrb[5].mxu1  ;;  %v967_v3 = vsel %vm352_vm1, %v3101_v60, -inf }
 0x3a5   : > { %968 = vmax.xlane.f32.xlu1 %v967_v3 }
 0x3a6   : > { %2256 = vmatmul.mubr.msk.f32.vlgmr.msra.gmra.mrb[6].mxu1 %vm572_vm3, %v1054_v62  ;;  %2267 = vmatmul.mubr.msk.f32.vlgmr.msra.gmra.mrb[16].mxu0 %vm497_vm2, %v1054_v62 }
 0x3a7   : > { %2462 = vmatpush3.bf16.msra.mxu0 %v2952_v15  ;;  %2474 = vmatpush3.bf16.msra.mxu1 %v2932_v8 }
 0x3a8   : > { %2463 = vmatprep.subr.bf16.mxu0 %v2749_v0  ;;  %2475 = vmatprep.subr.bf16.mxu1 %v2749_v0 }
 0x3a9   : > { %2285 = vmatprep.mubr.msk.f32.mxu0 %vm2750_vm0, %v2751_v1  ;;  %2296 = vmatprep.mubr.msk.f32.mxu1 %vm2750_vm0, %v2751_v1 }
 0x3ab   : > { %2465 = vmatpush3.bf16.msra.mxu0 %v2972_v21  ;;  %2477 = vmatpush3.bf16.msra.mxu1 %v2950_v14 }
 0x3ac   : > { %2466 = vmatprep.subr.bf16.mxu0 %v2749_v0  ;;  %2478 = vmatprep.subr.bf16.mxu1 %v2749_v0 }
 0x3af   : > { %2468 = vmatpush3.bf16.msra.mxu0 %v2989_v26 }
 0x3b0   : > { %2469 = vmatprep.subr.bf16.mxu0 %v2749_v0 }
 0x3b3   : > { %2471 = vmatpush3.bf16.msra.mxu0 %v3012_v31 }
 0x3b4   : > { %2490 = vmatprep.subr.bf16.mxu0 %v2749_v0 }
 0x432   : > { %v969_v30 = vpop.xlane.xlu1 %968 }
 0x479   : > { %v3125_v5 = vpop.f32.mrb[6].mxu1  ;;  %v1211_v6 = vpop.f32.mrb[16].mxu0 }
 0x47a   : > { %v1215_v7 = vadd.f32 %v1211_v6, %v1142_v4  ;;  %v2257_v9 = vpop.f32.mrb[7].mxu1  ;;  %v2268_v10 = vpop.f32.mrb[17].mxu0  ;;  %v1128_v11 = vsel %vm352_vm1, %v3125_v5, -inf }
 0x47b   : > { %1129 = vmax.xlane.f32.xlu1 %v1128_v11 }
 0x47c   : > { %2286 = vmatmul.mubr.msk.f32.vlgmr.msra.gmra.mrb[18].mxu0 %vm572_vm3, %v1215_v7  ;;  %2297 = vmatmul.mubr.msk.f32.vlgmr.msra.gmra.mrb[8].mxu1 %vm497_vm2, %v1215_v7 }
 0x47d   : > { %2480 = vmatpush3.bf16.msra.mxu1 %v2952_v15  ;;  %2492 = vmatpush3.bf16.msra.mxu0 %v2932_v8 }
 0x47e   : > { %2481 = vmatprep.subr.bf16.mxu1 %v2749_v0  ;;  %2493 = vmatprep.subr.bf16.mxu0 %v2749_v0 }
 0x47f   : > { %2315 = vmatprep.mubr.msk.f32.mxu1 %vm2750_vm0, %v2751_v1  ;;  %2326 = vmatprep.mubr.msk.f32.mxu0 %vm2750_vm0, %v2751_v1 }
 0x481   : > { %2483 = vmatpush3.bf16.msra.mxu1 %v2972_v21  ;;  %2495 = vmatpush3.bf16.msra.mxu0 %v2950_v14 }
 0x482   : > { %2484 = vmatprep.subr.bf16.mxu1 %v2749_v0  ;;  %2496 = vmatprep.subr.bf16.mxu0 %v2749_v0 }
 0x485   : > { %2486 = vmatpush3.bf16.msra.mxu1 %v2989_v26 }
 0x486   : > { %2487 = vmatprep.subr.bf16.mxu1 %v2749_v0 }
 0x489   : > { %2489 = vmatpush3.bf16.msra.mxu1 %v3012_v31 }
 0x48a   : > { %2508 = vmatprep.subr.bf16.mxu1 %v2749_v0 }
 0x508   : > { %v1130_v3 = vpop.xlane.xlu1 %1129 }
 0x509   : > { %v1131_v6 = vsub.f32 %v3125_v5, %v1130_v3 }
 0x50b   : > { %v1132_v9 = vmul.f32 1.442695, %v1131_v6 }
 0x54f   : > { %v1285_v13 = vpop.f32.mrb[18].mxu0  ;;  %v1372_v16 = vpop.f32.mrb[8].mxu1 }
 0x550   : > { %v1376_v17 = vadd.f32 %v1372_v16, %v1303_v12  ;;  %v2287_v18 = vpop.f32.mrb[19].mxu0  ;;  %v2298_v19 = vpop.f32.mrb[9].mxu1  ;;  %v1289_v20 = vsel %vm352_vm1, %v1285_v13, -inf }
 0x551   : > { %1290 = vmax.xlane.f32.xlu0 %v1289_v20 }
 0x552   : > { %2316 = vmatmul.mubr.msk.f32.vlgmr.msra.gmra.mrb[10].mxu1 %vm572_vm3, %v1376_v17  ;;  %2327 = vmatmul.mubr.msk.f32.vlgmr.msra.gmra.mrb[20].mxu0 %vm497_vm2, %v1376_v17 }
 0x553   : > { %2498 = vmatpush3.bf16.msra.mxu0 %v2952_v15  ;;  %2510 = vmatpush3.bf16.msra.mxu1 %v2932_v8  ;;  %v1464_v8 = vadd.f32 %v3026_v32, %v3051_v44 }
 0x554   : > { %2499 = vmatprep.subr.bf16.mxu0 %v2749_v0  ;;  %2511 = vmatprep.subr.bf16.mxu1 %v2749_v0 }
 0x555   : > { %2356 = vmatprep.mubr.msk.f32.mxu1 %vm2750_vm0, %v2751_v1  ;;  %2345 = vmatprep.mubr.msk.f32.mxu0 %vm2750_vm0, %v2751_v1 }
 0x557   : > { %2501 = vmatpush3.bf16.msra.mxu0 %v2972_v21  ;;  %2513 = vmatpush3.bf16.msra.mxu1 %v2950_v14 }
 0x558   : > { %2502 = vmatprep.subr.bf16.mxu0 %v2749_v0  ;;  %2514 = vmatprep.subr.bf16.mxu1 %v2749_v0 }
 0x55b   : > { %2504 = vmatpush3.bf16.msra.mxu0 %v2989_v26 }
 0x55c   : > { %2505 = vmatprep.subr.bf16.mxu0 %v2749_v0 }
 0x55f   : > { %2507 = vmatpush3.bf16.msra.mxu0 %v3012_v31 }
 0x625   : > { %v3169_v22 = vpop.f32.mrb[10].mxu1  ;;  %v1533_v23 = vpop.f32.mrb[20].mxu0 }
 0x626   : > { %v1537_v24 = vadd.f32 %v1533_v23, %v1464_v8  ;;  %v2317_v25 = vpop.f32.mrb[11].mxu1  ;;  %v2328_v27 = vpop.f32.mrb[21].mxu0  ;;  %v1450_v14 = vsel %vm352_vm1, %v3169_v22, -inf }
 0x627   : > { %1451 = vmax.xlane.f32.xlu1 %v1450_v14 }
 0x628   : > { %2346 = vmatmul.mubr.msk.f32.vlgmr.msra.gmra.mrb[22].mxu0 %vm572_vm3, %v1537_v24  ;;  %2357 = vmatmul.mubr.msk.f32.vlgmr.msra.gmra.mrb[12].mxu1 %vm497_vm2, %v1537_v24 }
 0x629   : > { %2516 = vmatpush3.bf16.msra.mxu1 %v2952_v15  ;;  %2375 = vmatprep.mubr.msk.f32.mxu1 %vm2750_vm0, %v2751_v1  ;;  %v808_v15 = vpop.xlane.xlu0 %807  ;;  %v970_v1 = vsub.f32 %v3101_v60, %v969_v30 }
 0x62a   : > { %2517 = vmatprep.subr.bf16.mxu1 %v2749_v0  ;;  %v809_v2 = vsub.f32 %v3077_v53, %v808_v15 }
 0x62c   : > { %v810_v4 = vmul.f32 1.442695, %v809_v2 }
 0x62d   : > { %2519 = vmatpush3.bf16.msra.mxu1 %v2972_v21  ;;  %v1291_v34 = vpop.xlane.xlu0 %1290  ;;  %v971_v21 = vmul.f32 1.442695, %v970_v1 }
 0x62e   : > { %2520 = vmatprep.subr.bf16.mxu1 %v2749_v0  ;;  %v1292_v35 = vsub.f32 %v1285_v13, %v1291_v34 }
 0x62f   : > { %2586 = vpow2.f32 %v971_v21 }
 0x630   : > { %v1293_v36 = vmul.f32 1.442695, %v1292_v35 }
 0x631   : > { %2522 = vmatpush3.bf16.msra.mxu1 %v2989_v26 }
 0x632   : > { %2523 = vmatprep.subr.bf16.mxu1 %v2749_v0  ;;  %v1625_v0 = vadd.f32 %v3049_v43, %v3026_v32  ;;  %2588 = vpow2.f32 %v1293_v36 }
 0x635   : > { %2525 = vmatpush3.bf16.msra.mxu1 %v3012_v31 }
 0x639   : > { %v2587_v32 = vpop.eup %2586 }
 0x63a   : > { %v973_v43 = vsel %vm352_vm1, %v2587_v32, 0.0 }
 0x63c   : > { %v2589_v44 = vpop.eup %2588 }
 0x63d   : > { %v1295_v45 = vsel %vm352_vm1, %v2589_v44, 0.0 }
 0x6b4   : > { %v1452_v7 = vpop.xlane.xlu1 %1451 }
 0x6b5   : > { %v1453_v10 = vsub.f32 %v3169_v22, %v1452_v7 }
 0x6b7   : > { %v1454_v11 = vmul.f32 1.442695, %v1453_v10 }
 0x6fb   : > { %v1607_v26 = vpop.f32.mrb[22].mxu0  ;;  %v1694_v31 = vpop.f32.mrb[12].mxu1 }
 0x6fc   : > { %v1698_v37 = vadd.f32 %v1694_v31, %v1625_v0  ;;  %v2347_v38 = vpop.f32.mrb[23].mxu0  ;;  %v2358_v39 = vpop.f32.mrb[13].mxu1  ;;  %v1611_v40 = vsel %vm352_vm1, %v1607_v26, -inf }
 0x6fd   : > { %1612 = vmax.xlane.f32.xlu0 %v1611_v40 }
 0x6fe   : > { %2376 = vmatmul.mubr.msk.f32.vlgmr.msra.gmra.mrb[14].mxu1 %vm572_vm3, %v1698_v37  ;;  %1786 = vst.msk [vmem:[%s3191_s12] sm:$0xff] %vm497_vm2, %v1698_v37 }
 0x701   : > { %653 = vadd.xlane.f32.xlu0 %v652_v42 }
 0x705   : > { %974 = vadd.xlane.f32.xlu0 %v973_v43 }
 0x709   : > { %1296 = vadd.xlane.f32.xlu0 %v1295_v45 }
 0x78a   : > { %v1613_v46 = vpop.xlane.xlu0 %1612 }
 0x78b   : > { %v1614_v47 = vsub.f32 %v1607_v26, %v1613_v46 }
 0x78d   : > { %v1615_v48 = vmul.f32 1.442695, %v1614_v47 }
 0x78e   : > { %v654_v49 = vpop.xlane.xlu0 %653 }
 0x78f   : > { %2590 = vpow2.f32 %v1615_v48 }
 0x790   : > { %2592 = vlog2.f32 %v654_v49 }
 0x792   : > { %v975_v50 = vpop.xlane.xlu0 %974 }
 0x793   : > { %2594 = vlog2.f32 %v975_v50 }
 0x796   : > { %v1297_v51 = vpop.xlane.xlu0 %1296 }
 0x797   : > { %2596 = vlog2.f32 %v1297_v51 }
 0x798   : > { %2598 = vpow2.f32 %v810_v4 }
 0x799   : > { %v2591_v52 = vpop.eup %2590  ;;  %2600 = vpow2.f32 %v1132_v9 }
 0x79a   : > { %v2593_v54 = vpop.eup %2592  ;;  %v1617_v55 = vsel %vm352_vm1, %v2591_v52, 0.0  ;;  %2602 = vpow2.f32 %v1454_v11 }
 0x79b   : > { %v656_v56 = vmul.f32 0.6931472, %v2593_v54  ;;  %1618 = vadd.xlane.f32.xlu0 %v1617_v55 }
 0x79d   : > { %v2595_v57 = vpop.eup %2594  ;;  %v657_v58 = vsub.f32 %v649_v29, %v656_v56 }
 0x79e   : > { %v977_v59 = vmul.f32 0.6931472, %v2595_v57 }
 0x79f   : > { %658 = vst.msk [vmem:[%s3201_s9] sm:$0xff] %vm352_vm1, %v657_v58 }
 0x7a0   : > { %v978_v60 = vsub.f32 %v970_v1, %v977_v59 }
 0x7a1   : > { %v2597_v61 = vpop.eup %2596 }
 0x7a2   : > { %1975 = vst.msk [vmem:[%s3201_s9 + $0x10] sm:$0xff] %vm352_vm1, %v978_v60  ;;  %v1299_v62 = vmul.f32 0.6931472, %v2597_v61  ;;  %v2599_v17 = vpop.eup %2598 }
 0x7a3   : > { %v812_v53 = vsel %vm352_vm1, %v2599_v17, 0.0  ;;  %v2601_v18 = vpop.eup %2600 }
 0x7a4   : > { %v1300_v63 = vsub.f32 %v1292_v35, %v1299_v62  ;;  %v1134_v5 = vsel %vm352_vm1, %v2601_v18, 0.0  ;;  %v2603_v19 = vpop.eup %2602 }
 0x7a5   : > { %v1456_v20 = vsel %vm352_vm1, %v2603_v19, 0.0 }
 0x7a6   : > { %1981 = vst.msk [vmem:[%s3201_s9 + $0x20] sm:$0xff] %vm352_vm1, %v1300_v63 }
 0x7d1   : > { %v1768_v12 = vpop.f32.mrb[14].mxu1 }
 0x7d2   : > { %v2377_v13 = vpop.f32.mrb[15].mxu1  ;;  %v1772_v16 = vsel %vm352_vm1, %v1768_v12, -inf }
 0x7d3   : > { %1773 = vmax.xlane.f32.xlu1 %v1772_v16 }
 0x7d7   : > { %813 = vadd.xlane.f32.xlu1 %v812_v53 }
 0x7db   : > { %1135 = vadd.xlane.f32.xlu1 %v1134_v5 }
 0x7df   : > { %1457 = vadd.xlane.f32.xlu1 %v1456_v20 }
 0x828   : > { %v1619_v8 = vpop.xlane.xlu0 %1618 }
 0x829   : > { %2604 = vlog2.f32 %v1619_v8 }
 0x833   : > { %v2605_v22 = vpop.eup %2604 }
 0x834   : > { %v1621_v23 = vmul.f32 0.6931472, %v2605_v22 }
 0x836   : > { %v1622_v24 = vsub.f32 %v1614_v47, %v1621_v23 }
 0x838   : > { %1987 = vst.msk [vmem:[%s3201_s9 + $0x30] sm:$0xff] %vm352_vm1, %v1622_v24 }
 0x860   : > { %v1774_v25 = vpop.xlane.xlu1 %1773 }
 0x861   : > { %v3218_v27 = vsub.f32 %v1768_v12, %v1774_v25 }
 0x863   : > { %v1776_v14 = vmul.f32 1.442695, %v3218_v27 }
 0x864   : > { %v814_v28 = vpop.xlane.xlu1 %813 }
 0x865   : > { %2606 = vpow2.f32 %v1776_v14 }
 0x866   : > { %2608 = vlog2.f32 %v814_v28 }
 0x868   : > { %v1136_v29 = vpop.xlane.xlu1 %1135 }
 0x869   : > { %2610 = vlog2.f32 %v1136_v29 }
 0x86c   : > { %v1458_v15 = vpop.xlane.xlu1 %1457 }
 0x86d   : > { %2612 = vlog2.f32 %v1458_v15 }
 0x86f   : > { %v2607_v30 = vpop.eup %2606 }
 0x870   : > { %v2609_v33 = vpop.eup %2608  ;;  %v1778_v1 = vsel %vm352_vm1, %v2607_v30, 0.0 }
 0x871   : > { %v816_v34 = vmul.f32 0.6931472, %v2609_v33  ;;  %1779 = vadd.xlane.f32.xlu1 %v1778_v1 }
 0x873   : > { %v2611_v21 = vpop.eup %2610  ;;  %v817_v35 = vsub.f32 %v809_v2, %v816_v34 }
 0x874   : > { %v1138_v36 = vmul.f32 0.6931472, %v2611_v21 }
 0x875   : > { %1972 = vst.msk [vmem:[%s3201_s9 + $0x8] sm:$0xff] %vm352_vm1, %v817_v35 }
 0x876   : > { %v1139_v0 = vsub.f32 %v1131_v6, %v1138_v36 }
 0x877   : > { %v2613_v26 = vpop.eup %2612 }
 0x878   : > { %1978 = vst.msk [vmem:[%s3201_s9 + $0x18] sm:$0xff] %vm352_vm1, %v1139_v0  ;;  %v1460_v31 = vmul.f32 0.6931472, %v2613_v26 }
 0x87a   : > { %v1461_v37 = vsub.f32 %v1453_v10, %v1460_v31 }
 0x87c   : > { %1984 = vst.msk [vmem:[%s3201_s9 + $0x28] sm:$0xff] %vm352_vm1, %v1461_v37 }
 0x87d   : > { %2659 = shalt.err (!%p2656_p4)
}
 0x87e   : > { %s2660_s20 = scalar_lea.hbm %s3233_s22, 128  ;;  %s2664_s11 = scalar_lea.hbm %s3314_s7, 256 }
 0x87f   : > { %p2661_p5 = scmp.ne.s32.totalorder %s3233_s22, %s2660_s20  ;;  %p2665_p1 = scmp.lt.u32.totalorder %s3233_s22, %s3314_s7 }
 0x880   : > { %p2666_p3 = scmp.lt.u32.totalorder %s2664_s11, %s2660_s20  ;;  %p2668_p6 = scmp.lt.u32.totalorder %s2660_s20, %s3233_s22 }
 0x881   : > { %p2662_p7 = pnand %p2661_p5, %p3321_p12 }
 0x882   : > { %p2667_p11 = por %p2666_p3, %p2665_p1 }
 0x883   : > { %p2663_p9 = pneg %p2662_p7 }
 0x884   : > { %p2669_p13 = por %p2668_p6, %p2667_p11 }
 0x886   : > { %p2670_p8 = pnand %p2669_p13, %p2663_p9 }
 0x888   : > { %2673 = shalt.err (!%p2670_p8)
}
 0x889   : > { %2529 = dma.vmem_to_hbm [thread:$0]  (%p3321_p12), %s1823_s8, 128, %s3233_s22, %s1793_s23  }
 0x88a   : > { %s1999_s29 = sshll.u32 %s2817_s28, 10  ;;  %s1806_s21 = sshll.u32 %s3201_s9, 4  ;;  %s3260_s21 = int_to_ptr.vmem [resolvable:$true] %s1806_s21 }
 0x88b   : > { %s3258_s12 = scalar_lea.hbm %s3313_s6, %s1999_s29  ;;  %s1788_s8 = scalar_lea.sflag [#allocation4], %s2900_s16 }
 0x88c   : > { %s2674_s22 = scalar_lea.vmem %s3260_s21, 1024  ;;  %s2753_s28 = smov [#allocation5]  }
 0x88d   : > { %p2675_p10 = scmp.ne.s32.totalorder %s3260_s21, %s2674_s22  ;;  %s2678_s23 = sshll.u32 %s2753_s28, 4  ;;  %s2679_s23 = int_to_ptr.vmem [resolvable:$false] %s2678_s23 }
 0x88e   : > { %s2680_s17 = scalar_lea.vmem %s2679_s23, 2048  ;;  %p2681_p4 = scmp.lt.s32.totalorder %s3260_s21, %s2679_s23 }
 0x88f   : > { %p2676_p0 = pnand %p2675_p10, %p3321_p12  ;;  %p2682_p5 = scmp.lt.s32.totalorder %s2680_s17, %s2674_s22 }
 0x891   : > { %p2677_p2 = pneg %p2676_p0  ;;  %p2683_p7 = por %p2682_p5, %p2681_p4 }
 0x893   : > { %p2684_p9 = pnand %p2683_p7, %p2677_p2 }
 0x8fe   : > { %v1780_v38 = vpop.xlane.xlu1 %1779 }
 0x8ff   : > { %2614 = vlog2.f32 %v1780_v38 }
 0x909   : > { %v2615_v39 = vpop.eup %2614 }
 0x90a   : > { %v1782_v40 = vmul.f32 0.6931472, %v2615_v39 }
 0x90c   : > { %v1783_v41 = vsub.f32 %v3218_v27, %v1782_v40 }
 0x90e   : > { %1990 = vst.msk [vmem:[%s3201_s9 + $0x38] sm:$0xff] %vm352_vm1, %v1783_v41 }
 0x90f   : > { %2687 = shalt.err (!%p2684_p9)
}
 0x910   : > { %s2688_s9 = scalar_lea.hbm %s3258_s12, 1024  ;;  %s2692_s19 = scalar_lea.hbm %s3313_s6, 2048 }
 0x911   : > { %p2689_p1 = scmp.ne.s32.totalorder %s3258_s12, %s2688_s9  ;;  %p2693_p6 = scmp.lt.u32.totalorder %s3258_s12, %s3313_s6 }
 0x912   : > { %p2694_p13 = scmp.lt.u32.totalorder %s2692_s19, %s2688_s9  ;;  %p2696_p10 = scmp.lt.u32.totalorder %s2688_s9, %s3258_s12 }
 0x913   : > { %p2690_p3 = pnand %p2689_p1, %p3321_p12 }
 0x914   : > { %p2695_p8 = por %p2694_p13, %p2693_p6 }
 0x915   : > { %p2691_p11 = pneg %p2690_p3 }
 0x916   : > { %p2697_p0 = por %p2696_p10, %p2695_p8 }
 0x918   : > { %p2698_p2 = pnand %p2697_p0, %p2691_p11 }
 0x91a   : > { %2701 = shalt.err (!%p2698_p2)
}
 0x91b   : > { %s2754_s20 = smov 128   ;;  %s2755_s22 = smov 8  }
 0x91c   : > { %2528 = dma.vmem_to_hbm [thread:$0]  (%p3321_p12), %s3260_s21, 1024, %s3258_s12, %s1788_s8, %s2754_s20, %s2754_s20, %s2755_s22  }
 0x91d PF: > { %s1834_s28 = sand.u32 1, %s2732_s24   ;;  %p3322_p4 = scmp.ne.s32.totalorder %s3319_s14, 0 }
 0x91e   : > { %p3323_p5 = scmp.ge.s32.totalorder %s2744_s27, 2  ;;  %s1835_s23 = scalar_lea.sflag [#allocation4], %s1834_s28 }
 0x920   : > { %p2537_p7 = pnand %p3323_p5, %p3322_p4 }
 0x922   : > { %2723 = dma.done.wait (!%p2537_p7), %s1835_s23, 1024  }
 0x923   : > { %2725 = vsyncadd (!%p2537_p7), %s1835_s23, 4294966272  ;;  %s1844_s17 = scalar_lea.sflag [#allocation7], %s1834_s28 }
 0x924   : > { %2727 = dma.done.wait (!%p2537_p7), %s1844_s17, 128  }
 0x925   : > { %2729 = vsyncadd (!%p2537_p7), %s1844_s17, 4294967168  ;;  %p24_p12 = scmp.ge.s32.totalorder %s2821_s30, 4   ;;  %s3324_s24 = smov %s2736_s25 }
 0x926   : > { %s3325_s25 = smov %s2740_s26  ;;  %s3326_s26 = smov %s2833_s10 }
 0x927   : > { %s3327_s27 = smov %s2821_s30  ;;  %26 = sbr.rel (!%p24_p12) target bundleno = 7 (0x7), region = 119 }
 0x92e   :  { %1849 = vsyncpa [#allocation3], 1 }
 0x92f   :  { %1851 = vsyncpa [#allocation3 + $0x1], 1 }
 0x930   :  { %1852 = vsyncpa [#allocation4], 1 }
 0x931   :  { %1854 = vsyncpa [#allocation4 + $0x1], 1 }
 0x932   :  { %1855 = vsyncpa [#allocation7], 1 }
 0x933   :  { %1857 = vsyncpa [#allocation7 + $0x1], 1 }

</bundles_post_ra>
